<compile_context>
chip_gen: v7x
topology: tpu7x:2x2x1
jax: 0.10.0
libtpu: 0.0.40
codegen_flags: <defaults>
</compile_context>

<pallas_src>
import jax
import jax.numpy as jnp
from jax.experimental import pallas as pl
from jax.experimental.pallas import tpu as pltpu


def cfg_denoiser_kernel(params_ref,  # SMEM (3*C*C + C,) f32 flat params
                        z_ref,       # VMEM (C, block_hw)  latent z block
                        ccc_ref,     # VMEM (C, block_hw)  cond['c_concat'] block
                        ccu_ref,     # VMEM (C, block_hw)  uncond['c_concat'] block
                        out_ref):    # VMEM (C, block_hw)
    """params layout (all pre-scaled in the wrapper, grid-invariant):
         [0        : C*C    )  wa  = s * W1[:C]                 (z path)
         [C*C      : 2*C*C  )  wbc = s * image_cfg * W1[C:]     (cond c_concat)
         [2*C*C    : 3*C*C  )  wbu = s * (1-image_cfg) * W1[C:] (uncond c_concat)
         [3*C*C    : 3*C*C+C)  col = s * (b1 + g_u + text_cfg*(g_c - g_u))
    """
    C = out_ref.shape[0]
    off_wbc = C * C
    off_wbu = 2 * C * C
    off_col = 3 * C * C

    # Python-unrolled scalar(SMEM) x vreg FMAs; one output row at a time keeps
    # the live vreg set to ~one accumulator + one input row (no 3-D temps).
    for co in range(C):
        acc = params_ref[off_col + co] + params_ref[co] * z_ref[0, :]
        for ci in range(1, C):
            acc = acc + params_ref[ci * C + co] * z_ref[ci, :]
        for ci in range(C):
            acc = acc + params_ref[off_wbc + ci * C + co] * ccc_ref[ci, :]
        for ci in range(C):
            acc = acc + params_ref[off_wbu + ci * C + co] * ccu_ref[ci, :]
        out_ref[co, :] = acc


def _pick_block_hw(hw):
    """Two lane-blocks when HW splits into 128-multiples (feeds both v7x
    TensorCores via "parallel"); otherwise a single full block (1 grid step on
    v5e/v6e where extra steps are pure overhead)."""
    half = hw // 2
    if hw % 2 == 0 and half % 128 == 0:
        return half
    return hw


def cfg_denoise(z, sigma, cond, uncond, text_cfg_scale, image_cfg_scale, params):
    """z: (1,C,H,W), sigma: (1,), cond/uncond: dicts with 'c_crossattn' [(1,T,D)]
    and 'c_concat' [(1,C,H,W)].  Returns (1,C,H,W)."""
    assert z.shape[0] == 1, "CFGDenoiser assumes batch size 1 (einops '1 ... -> n ...')"
    _, C, H, W = z.shape
    HW = H * W
    w1, b1, w2 = params

    # Lane-dense (C, HW) layout: plain reshapes, no transposes over HBM.
    z2d = z[0].reshape(C, HW)
    ccc2d = cond['c_concat'][0][0].reshape(C, HW)
    ccu2d = uncond['c_concat'][0][0].reshape(C, HW)
    ctx_c = cond['c_crossattn'][0][0]          # (T, D)
    ctx_u = uncond['c_crossattn'][0][0]        # (T, D)

    # --- grid-invariant math hoisted out of the kernel (fuses under jit) ---
    s = 1.0 / (sigma[0] * sigma[0] + 1.0)
    g_c = jnp.mean(ctx_c, axis=0) @ w2                                   # (C,)
    g_u = jnp.mean(ctx_u, axis=0) @ w2                                   # (C,)
    col = s * (b1.reshape(C) + g_u + text_cfg_scale * (g_c - g_u))       # (C,)
    wa = s * w1[:C]                                                      # (C, C)
    wbc = (s * image_cfg_scale) * w1[C:]                                 # (C, C)
    wbu = (s * (1.0 - image_cfg_scale)) * w1[C:]                         # (C, C)
    params_vec = jnp.concatenate(
        [wa.reshape(-1), wbc.reshape(-1), wbu.reshape(-1), col.reshape(-1)]
    ).astype(jnp.float32)                                                # (3C^2+C,)

    block_hw = _pick_block_hw(HW)
    grid = (HW // block_hw,)
    pix = pl.BlockSpec((C, block_hw), lambda i: (0, i))

    out2d = pl.pallas_call(
        cfg_denoiser_kernel,
        out_shape=jax.ShapeDtypeStruct((C, HW), jnp.float32),
        grid=grid,
        in_specs=[
            pl.BlockSpec(memory_space=pltpu.MemorySpace.SMEM),   # flat params
            pix, pix, pix,                                       # z, cc_cond, cc_uncond
        ],
        out_specs=pix,
        compiler_params=pltpu.CompilerParams(
            dimension_semantics=("parallel",),                   # v7x: shard HW over both TCs
            vmem_limit_bytes=32 * 1024 * 1024,                   # safe on all generations
        ),
    )(params_vec, z2d, ccc2d, ccu2d)

    # (C, HW) -> (1, C, H, W): pure reshape, no transpose.
    return out2d.reshape(1, C, H, W)


# jit the whole wrapper so the tiny pre-compute ops fuse with the pallas_call
# dispatch instead of running as separate eager XLA executions.
cfg_denoise_jit = jax.jit(cfg_denoise)


def _reference(z, sigma, cond, uncond, text_cfg, image_cfg, params):
    """Pure-JAX reference with the original 3-branch CFG structure."""
    w1, b1, w2 = params
    s = 1.0 / (sigma[0] * sigma[0] + 1.0)

    def inner(ccat, ctx):
        x = jnp.concatenate([z, ccat], axis=1)                      # (1, 2C, H, W)
        h = jnp.einsum('bchw,cd->bdhw', x, w1) + b1.reshape(1, -1, 1, 1)
        g = jnp.mean(ctx, axis=1) @ w2                              # (1, C)
        return (h + g.reshape(1, -1, 1, 1)) * s

    out_cond = inner(cond['c_concat'][0], cond['c_crossattn'][0])
    out_img = inner(cond['c_concat'][0], uncond['c_crossattn'][0])
    out_unc = inner(uncond['c_concat'][0], uncond['c_crossattn'][0])
    return (out_unc + text_cfg * (out_cond - out_img)
            + image_cfg * (out_img - out_unc))


if __name__ == "__main__":
    C, H, W, T, D = 4, 16, 16, 8, 32

    key = jax.random.PRNGKey(0)
    keys = jax.random.split(key, 8)

    z = jax.random.normal(keys[0], (1, C, H, W), jnp.float32)
    sigma = jnp.array([1.5], jnp.float32)
    cond = {
        'c_crossattn': [jax.random.normal(keys[1], (1, T, D), jnp.float32)],
        'c_concat':    [jax.random.normal(keys[2], (1, C, H, W), jnp.float32)],
    }
    uncond = {
        'c_crossattn': [jax.random.normal(keys[3], (1, T, D), jnp.float32)],
        'c_concat':    [jax.random.normal(keys[4], (1, C, H, W), jnp.float32)],
    }

    # Deterministic synthetic parameters of the affine inner model.
    w1 = 0.1 * jax.random.normal(keys[5], (2 * C, C), jnp.float32)
    b1 = 0.1 * jax.random.normal(keys[6], (1, C), jnp.float32)
    w2 = 0.1 * jax.random.normal(keys[7], (D, C), jnp.float32)

    out = cfg_denoise_jit(z, sigma, cond, uncond,
                          text_cfg_scale=7.5, image_cfg_scale=1.5,
                          params=(w1, b1, w2))
    out = jax.block_until_ready(out)
    assert out.shape == (1, C, H, W)

    ref = jax.block_until_ready(
        _reference(z, sigma, cond, uncond, 7.5, 1.5, (w1, b1, w2)))
    max_err = float(jnp.max(jnp.abs(out - ref)))
    assert jnp.allclose(out, ref, atol=2e-4, rtol=2e-4), max_err

    print("KERNEL_OK")
</pallas_src>

<mosaic_0001>
module attributes {stable_mosaic.version = 11 : i64} {
  func.func @cfg_denoiser_kernel(%arg0: i32, %arg1: memref<52xf32, #tpu.memory_space<smem>>, %arg2: memref<4x128xf32, #tpu.memory_space<vmem>>, %arg3: memref<4x128xf32, #tpu.memory_space<vmem>>, %arg4: memref<4x128xf32, #tpu.memory_space<vmem>>, %arg5: memref<4x128xf32, #tpu.memory_space<vmem>>) attributes {dimension_semantics = [#tpu.dimension_semantics<parallel>], iteration_bounds = array<i64: 2>, scalar_prefetch = 0 : i64, scratch_operands = 0 : i64, tpu.core_type = #tpu.core_type<tc>, window_params = [{transform_indices = @transform_0, window_bounds = array<i64: 52>}, {transform_indices = @transform_1, window_bounds = array<i64: 4, 128>}, {transform_indices = @transform_2, window_bounds = array<i64: 4, 128>}, {transform_indices = @transform_3, window_bounds = array<i64: 4, 128>}, {transform_indices = @transform_4, window_bounds = array<i64: 4, 128>}]} {
    %c48 = arith.constant 48 : index
    %0 = memref.load %arg1[%c48] : memref<52xf32, #tpu.memory_space<smem>>
    %c0 = arith.constant 0 : index
    %1 = memref.load %arg1[%c0] : memref<52xf32, #tpu.memory_space<smem>>
    %c0_0 = arith.constant 0 : index
    %c0_1 = arith.constant 0 : index
    %2 = vector.load %arg2[%c0_0, %c0_1] : memref<4x128xf32, #tpu.memory_space<vmem>>, vector<1x128xf32>
    %3 = vector.shape_cast %2 : vector<1x128xf32> to vector<128xf32>
    %4 = vector.broadcast %1 : f32 to vector<128xf32>
    %5 = arith.mulf %4, %3 : vector<128xf32>
    %6 = vector.broadcast %0 : f32 to vector<128xf32>
    %7 = arith.addf %6, %5 : vector<128xf32>
    %c4 = arith.constant 4 : index
    %8 = memref.load %arg1[%c4] : memref<52xf32, #tpu.memory_space<smem>>
    %c1 = arith.constant 1 : index
    %c0_2 = arith.constant 0 : index
    %9 = vector.load %arg2[%c1, %c0_2] : memref<4x128xf32, #tpu.memory_space<vmem>>, vector<1x128xf32>
    %10 = vector.shape_cast %9 : vector<1x128xf32> to vector<128xf32>
    %11 = vector.broadcast %8 : f32 to vector<128xf32>
    %12 = arith.mulf %11, %10 : vector<128xf32>
    %13 = arith.addf %7, %12 : vector<128xf32>
    %c8 = arith.constant 8 : index
    %14 = memref.load %arg1[%c8] : memref<52xf32, #tpu.memory_space<smem>>
    %c2 = arith.constant 2 : index
    %c0_3 = arith.constant 0 : index
    %15 = vector.load %arg2[%c2, %c0_3] : memref<4x128xf32, #tpu.memory_space<vmem>>, vector<1x128xf32>
    %16 = vector.shape_cast %15 : vector<1x128xf32> to vector<128xf32>
    %17 = vector.broadcast %14 : f32 to vector<128xf32>
    %18 = arith.mulf %17, %16 : vector<128xf32>
    %19 = arith.addf %13, %18 : vector<128xf32>
    %c12 = arith.constant 12 : index
    %20 = memref.load %arg1[%c12] : memref<52xf32, #tpu.memory_space<smem>>
    %c3 = arith.constant 3 : index
    %c0_4 = arith.constant 0 : index
    %21 = vector.load %arg2[%c3, %c0_4] : memref<4x128xf32, #tpu.memory_space<vmem>>, vector<1x128xf32>
    %22 = vector.shape_cast %21 : vector<1x128xf32> to vector<128xf32>
    %23 = vector.broadcast %20 : f32 to vector<128xf32>
    %24 = arith.mulf %23, %22 : vector<128xf32>
    %25 = arith.addf %19, %24 : vector<128xf32>
    %c16 = arith.constant 16 : index
    %26 = memref.load %arg1[%c16] : memref<52xf32, #tpu.memory_space<smem>>
    %c0_5 = arith.constant 0 : index
    %c0_6 = arith.constant 0 : index
    %27 = vector.load %arg3[%c0_5, %c0_6] : memref<4x128xf32, #tpu.memory_space<vmem>>, vector<1x128xf32>
    %28 = vector.shape_cast %27 : vector<1x128xf32> to vector<128xf32>
    %29 = vector.broadcast %26 : f32 to vector<128xf32>
    %30 = arith.mulf %29, %28 : vector<128xf32>
    %31 = arith.addf %25, %30 : vector<128xf32>
    %c20 = arith.constant 20 : index
    %32 = memref.load %arg1[%c20] : memref<52xf32, #tpu.memory_space<smem>>
    %c1_7 = arith.constant 1 : index
    %c0_8 = arith.constant 0 : index
    %33 = vector.load %arg3[%c1_7, %c0_8] : memref<4x128xf32, #tpu.memory_space<vmem>>, vector<1x128xf32>
    %34 = vector.shape_cast %33 : vector<1x128xf32> to vector<128xf32>
    %35 = vector.broadcast %32 : f32 to vector<128xf32>
    %36 = arith.mulf %35, %34 : vector<128xf32>
    %37 = arith.addf %31, %36 : vector<128xf32>
    %c24 = arith.constant 24 : index
    %38 = memref.load %arg1[%c24] : memref<52xf32, #tpu.memory_space<smem>>
    %c2_9 = arith.constant 2 : index
    %c0_10 = arith.constant 0 : index
    %39 = vector.load %arg3[%c2_9, %c0_10] : memref<4x128xf32, #tpu.memory_space<vmem>>, vector<1x128xf32>
    %40 = vector.shape_cast %39 : vector<1x128xf32> to vector<128xf32>
    %41 = vector.broadcast %38 : f32 to vector<128xf32>
    %42 = arith.mulf %41, %40 : vector<128xf32>
    %43 = arith.addf %37, %42 : vector<128xf32>
    %c28 = arith.constant 28 : index
    %44 = memref.load %arg1[%c28] : memref<52xf32, #tpu.memory_space<smem>>
    %c3_11 = arith.constant 3 : index
    %c0_12 = arith.constant 0 : index
    %45 = vector.load %arg3[%c3_11, %c0_12] : memref<4x128xf32, #tpu.memory_space<vmem>>, vector<1x128xf32>
    %46 = vector.shape_cast %45 : vector<1x128xf32> to vector<128xf32>
    %47 = vector.broadcast %44 : f32 to vector<128xf32>
    %48 = arith.mulf %47, %46 : vector<128xf32>
    %49 = arith.addf %43, %48 : vector<128xf32>
    %c32 = arith.constant 32 : index
    %50 = memref.load %arg1[%c32] : memref<52xf32, #tpu.memory_space<smem>>
    %c0_13 = arith.constant 0 : index
    %c0_14 = arith.constant 0 : index
    %51 = vector.load %arg4[%c0_13, %c0_14] : memref<4x128xf32, #tpu.memory_space<vmem>>, vector<1x128xf32>
    %52 = vector.shape_cast %51 : vector<1x128xf32> to vector<128xf32>
    %53 = vector.broadcast %50 : f32 to vector<128xf32>
    %54 = arith.mulf %53, %52 : vector<128xf32>
    %55 = arith.addf %49, %54 : vector<128xf32>
    %c36 = arith.constant 36 : index
    %56 = memref.load %arg1[%c36] : memref<52xf32, #tpu.memory_space<smem>>
    %c1_15 = arith.constant 1 : index
    %c0_16 = arith.constant 0 : index
    %57 = vector.load %arg4[%c1_15, %c0_16] : memref<4x128xf32, #tpu.memory_space<vmem>>, vector<1x128xf32>
    %58 = vector.shape_cast %57 : vector<1x128xf32> to vector<128xf32>
    %59 = vector.broadcast %56 : f32 to vector<128xf32>
    %60 = arith.mulf %59, %58 : vector<128xf32>
    %61 = arith.addf %55, %60 : vector<128xf32>
    %c40 = arith.constant 40 : index
    %62 = memref.load %arg1[%c40] : memref<52xf32, #tpu.memory_space<smem>>
    %c2_17 = arith.constant 2 : index
    %c0_18 = arith.constant 0 : index
    %63 = vector.load %arg4[%c2_17, %c0_18] : memref<4x128xf32, #tpu.memory_space<vmem>>, vector<1x128xf32>
    %64 = vector.shape_cast %63 : vector<1x128xf32> to vector<128xf32>
    %65 = vector.broadcast %62 : f32 to vector<128xf32>
    %66 = arith.mulf %65, %64 : vector<128xf32>
    %67 = arith.addf %61, %66 : vector<128xf32>
    %c44 = arith.constant 44 : index
    %68 = memref.load %arg1[%c44] : memref<52xf32, #tpu.memory_space<smem>>
    %c3_19 = arith.constant 3 : index
    %c0_20 = arith.constant 0 : index
    %69 = vector.load %arg4[%c3_19, %c0_20] : memref<4x128xf32, #tpu.memory_space<vmem>>, vector<1x128xf32>
    %70 = vector.shape_cast %69 : vector<1x128xf32> to vector<128xf32>
    %71 = vector.broadcast %68 : f32 to vector<128xf32>
    %72 = arith.mulf %71, %70 : vector<128xf32>
    %73 = arith.addf %67, %72 : vector<128xf32>
    %c0_21 = arith.constant 0 : index
    %c0_22 = arith.constant 0 : index
    %74 = vector.load %arg5[%c0_21, %c0_22] : memref<4x128xf32, #tpu.memory_space<vmem>>, vector<1x128xf32>
    %75 = vector.shape_cast %74 : vector<1x128xf32> to vector<128xf32>
    %76 = vector.shape_cast %73 : vector<128xf32> to vector<1x128xf32>
    tpu.vector_store %arg5[%c0_21, %c0_22], %76 {strides = array<i32>} : memref<4x128xf32, #tpu.memory_space<vmem>>, vector<1x128xf32>,
    %c49 = arith.constant 49 : index
    %77 = memref.load %arg1[%c49] : memref<52xf32, #tpu.memory_space<smem>>
    %c1_23 = arith.constant 1 : index
    %78 = memref.load %arg1[%c1_23] : memref<52xf32, #tpu.memory_space<smem>>
    %c0_24 = arith.constant 0 : index
    %c0_25 = arith.constant 0 : index
    %79 = vector.load %arg2[%c0_24, %c0_25] : memref<4x128xf32, #tpu.memory_space<vmem>>, vector<1x128xf32>
    %80 = vector.shape_cast %79 : vector<1x128xf32> to vector<128xf32>
    %81 = vector.broadcast %78 : f32 to vector<128xf32>
    %82 = arith.mulf %81, %80 : vector<128xf32>
    %83 = vector.broadcast %77 : f32 to vector<128xf32>
    %84 = arith.addf %83, %82 : vector<128xf32>
    %c5 = arith.constant 5 : index
    %85 = memref.load %arg1[%c5] : memref<52xf32, #tpu.memory_space<smem>>
    %c1_26 = arith.constant 1 : index
    %c0_27 = arith.constant 0 : index
    %86 = vector.load %arg2[%c1_26, %c0_27] : memref<4x128xf32, #tpu.memory_space<vmem>>, vector<1x128xf32>
    %87 = vector.shape_cast %86 : vector<1x128xf32> to vector<128xf32>
    %88 = vector.broadcast %85 : f32 to vector<128xf32>
    %89 = arith.mulf %88, %87 : vector<128xf32>
    %90 = arith.addf %84, %89 : vector<128xf32>
    %c9 = arith.constant 9 : index
    %91 = memref.load %arg1[%c9] : memref<52xf32, #tpu.memory_space<smem>>
    %c2_28 = arith.constant 2 : index
    %c0_29 = arith.constant 0 : index
    %92 = vector.load %arg2[%c2_28, %c0_29] : memref<4x128xf32, #tpu.memory_space<vmem>>, vector<1x128xf32>
    %93 = vector.shape_cast %92 : vector<1x128xf32> to vector<128xf32>
    %94 = vector.broadcast %91 : f32 to vector<128xf32>
    %95 = arith.mulf %94, %93 : vector<128xf32>
    %96 = arith.addf %90, %95 : vector<128xf32>
    %c13 = arith.constant 13 : index
    %97 = memref.load %arg1[%c13] : memref<52xf32, #tpu.memory_space<smem>>
    %c3_30 = arith.constant 3 : index
    %c0_31 = arith.constant 0 : index
    %98 = vector.load %arg2[%c3_30, %c0_31] : memref<4x128xf32, #tpu.memory_space<vmem>>, vector<1x128xf32>
    %99 = vector.shape_cast %98 : vector<1x128xf32> to vector<128xf32>
    %100 = vector.broadcast %97 : f32 to vector<128xf32>
    %101 = arith.mulf %100, %99 : vector<128xf32>
    %102 = arith.addf %96, %101 : vector<128xf32>
    %c17 = arith.constant 17 : index
    %103 = memref.load %arg1[%c17] : memref<52xf32, #tpu.memory_space<smem>>
    %c0_32 = arith.constant 0 : index
    %c0_33 = arith.constant 0 : index
    %104 = vector.load %arg3[%c0_32, %c0_33] : memref<4x128xf32, #tpu.memory_space<vmem>>, vector<1x128xf32>
    %105 = vector.shape_cast %104 : vector<1x128xf32> to vector<128xf32>
    %106 = vector.broadcast %103 : f32 to vector<128xf32>
    %107 = arith.mulf %106, %105 : vector<128xf32>
    %108 = arith.addf %102, %107 : vector<128xf32>
    %c21 = arith.constant 21 : index
    %109 = memref.load %arg1[%c21] : memref<52xf32, #tpu.memory_space<smem>>
    %c1_34 = arith.constant 1 : index
    %c0_35 = arith.constant 0 : index
    %110 = vector.load %arg3[%c1_34, %c0_35] : memref<4x128xf32, #tpu.memory_space<vmem>>, vector<1x128xf32>
    %111 = vector.shape_cast %110 : vector<1x128xf32> to vector<128xf32>
    %112 = vector.broadcast %109 : f32 to vector<128xf32>
    %113 = arith.mulf %112, %111 : vector<128xf32>
    %114 = arith.addf %108, %113 : vector<128xf32>
    %c25 = arith.constant 25 : index
    %115 = memref.load %arg1[%c25] : memref<52xf32, #tpu.memory_space<smem>>
    %c2_36 = arith.constant 2 : index
    %c0_37 = arith.constant 0 : index
    %116 = vector.load %arg3[%c2_36, %c0_37] : memref<4x128xf32, #tpu.memory_space<vmem>>, vector<1x128xf32>
    %117 = vector.shape_cast %116 : vector<1x128xf32> to vector<128xf32>
    %118 = vector.broadcast %115 : f32 to vector<128xf32>
    %119 = arith.mulf %118, %117 : vector<128xf32>
    %120 = arith.addf %114, %119 : vector<128xf32>
    %c29 = arith.constant 29 : index
    %121 = memref.load %arg1[%c29] : memref<52xf32, #tpu.memory_space<smem>>
    %c3_38 = arith.constant 3 : index
    %c0_39 = arith.constant 0 : index
    %122 = vector.load %arg3[%c3_38, %c0_39] : memref<4x128xf32, #tpu.memory_space<vmem>>, vector<1x128xf32>
    %123 = vector.shape_cast %122 : vector<1x128xf32> to vector<128xf32>
    %124 = vector.broadcast %121 : f32 to vector<128xf32>
    %125 = arith.mulf %124, %123 : vector<128xf32>
    %126 = arith.addf %120, %125 : vector<128xf32>
    %c33 = arith.constant 33 : index
    %127 = memref.load %arg1[%c33] : memref<52xf32, #tpu.memory_space<smem>>
    %c0_40 = arith.constant 0 : index
    %c0_41 = arith.constant 0 : index
    %128 = vector.load %arg4[%c0_40, %c0_41] : memref<4x128xf32, #tpu.memory_space<vmem>>, vector<1x128xf32>
    %129 = vector.shape_cast %128 : vector<1x128xf32> to vector<128xf32>
    %130 = vector.broadcast %127 : f32 to vector<128xf32>
    %131 = arith.mulf %130, %129 : vector<128xf32>
    %132 = arith.addf %126, %131 : vector<128xf32>
    %c37 = arith.constant 37 : index
    %133 = memref.load %arg1[%c37] : memref<52xf32, #tpu.memory_space<smem>>
    %c1_42 = arith.constant 1 : index
    %c0_43 = arith.constant 0 : index
    %134 = vector.load %arg4[%c1_42, %c0_43] : memref<4x128xf32, #tpu.memory_space<vmem>>, vector<1x128xf32>
    %135 = vector.shape_cast %134 : vector<1x128xf32> to vector<128xf32>
    %136 = vector.broadcast %133 : f32 to vector<128xf32>
    %137 = arith.mulf %136, %135 : vector<128xf32>
    %138 = arith.addf %132, %137 : vector<128xf32>
    %c41 = arith.constant 41 : index
    %139 = memref.load %arg1[%c41] : memref<52xf32, #tpu.memory_space<smem>>
    %c2_44 = arith.constant 2 : index
    %c0_45 = arith.constant 0 : index
    %140 = vector.load %arg4[%c2_44, %c0_45] : memref<4x128xf32, #tpu.memory_space<vmem>>, vector<1x128xf32>
    %141 = vector.shape_cast %140 : vector<1x128xf32> to vector<128xf32>
    %142 = vector.broadcast %139 : f32 to vector<128xf32>
    %143 = arith.mulf %142, %141 : vector<128xf32>
    %144 = arith.addf %138, %143 : vector<128xf32>
    %c45 = arith.constant 45 : index
    %145 = memref.load %arg1[%c45] : memref<52xf32, #tpu.memory_space<smem>>
    %c3_46 = arith.constant 3 : index
    %c0_47 = arith.constant 0 : index
    %146 = vector.load %arg4[%c3_46, %c0_47] : memref<4x128xf32, #tpu.memory_space<vmem>>, vector<1x128xf32>
    %147 = vector.shape_cast %146 : vector<1x128xf32> to vector<128xf32>
    %148 = vector.broadcast %145 : f32 to vector<128xf32>
    %149 = arith.mulf %148, %147 : vector<128xf32>
    %150 = arith.addf %144, %149 : vector<128xf32>
    %c1_48 = arith.constant 1 : index
    %c0_49 = arith.constant 0 : index
    %151 = vector.load %arg5[%c1_48, %c0_49] : memref<4x128xf32, #tpu.memory_space<vmem>>, vector<1x128xf32>
    %152 = vector.shape_cast %151 : vector<1x128xf32> to vector<128xf32>
    %153 = vector.shape_cast %150 : vector<128xf32> to vector<1x128xf32>
    tpu.vector_store %arg5[%c1_48, %c0_49], %153 {strides = array<i32>} : memref<4x128xf32, #tpu.memory_space<vmem>>, vector<1x128xf32>,
    %c50 = arith.constant 50 : index
    %154 = memref.load %arg1[%c50] : memref<52xf32, #tpu.memory_space<smem>>
    %c2_50 = arith.constant 2 : index
    %155 = memref.load %arg1[%c2_50] : memref<52xf32, #tpu.memory_space<smem>>
    %c0_51 = arith.constant 0 : index
    %c0_52 = arith.constant 0 : index
    %156 = vector.load %arg2[%c0_51, %c0_52] : memref<4x128xf32, #tpu.memory_space<vmem>>, vector<1x128xf32>
    %157 = vector.shape_cast %156 : vector<1x128xf32> to vector<128xf32>
    %158 = vector.broadcast %155 : f32 to vector<128xf32>
    %159 = arith.mulf %158, %157 : vector<128xf32>
    %160 = vector.broadcast %154 : f32 to vector<128xf32>
    %161 = arith.addf %160, %159 : vector<128xf32>
    %c6 = arith.constant 6 : index
    %162 = memref.load %arg1[%c6] : memref<52xf32, #tpu.memory_space<smem>>
    %c1_53 = arith.constant 1 : index
    %c0_54 = arith.constant 0 : index
    %163 = vector.load %arg2[%c1_53, %c0_54] : memref<4x128xf32, #tpu.memory_space<vmem>>, vector<1x128xf32>
    %164 = vector.shape_cast %163 : vector<1x128xf32> to vector<128xf32>
    %165 = vector.broadcast %162 : f32 to vector<128xf32>
    %166 = arith.mulf %165, %164 : vector<128xf32>
    %167 = arith.addf %161, %166 : vector<128xf32>
    %c10 = arith.constant 10 : index
    %168 = memref.load %arg1[%c10] : memref<52xf32, #tpu.memory_space<smem>>
    %c2_55 = arith.constant 2 : index
    %c0_56 = arith.constant 0 : index
    %169 = vector.load %arg2[%c2_55, %c0_56] : memref<4x128xf32, #tpu.memory_space<vmem>>, vector<1x128xf32>
    %170 = vector.shape_cast %169 : vector<1x128xf32> to vector<128xf32>
    %171 = vector.broadcast %168 : f32 to vector<128xf32>
    %172 = arith.mulf %171, %170 : vector<128xf32>
    %173 = arith.addf %167, %172 : vector<128xf32>
    %c14 = arith.constant 14 : index
    %174 = memref.load %arg1[%c14] : memref<52xf32, #tpu.memory_space<smem>>
    %c3_57 = arith.constant 3 : index
    %c0_58 = arith.constant 0 : index
    %175 = vector.load %arg2[%c3_57, %c0_58] : memref<4x128xf32, #tpu.memory_space<vmem>>, vector<1x128xf32>
    %176 = vector.shape_cast %175 : vector<1x128xf32> to vector<128xf32>
    %177 = vector.broadcast %174 : f32 to vector<128xf32>
    %178 = arith.mulf %177, %176 : vector<128xf32>
    %179 = arith.addf %173, %178 : vector<128xf32>
    %c18 = arith.constant 18 : index
    %180 = memref.load %arg1[%c18] : memref<52xf32, #tpu.memory_space<smem>>
    %c0_59 = arith.constant 0 : index
    %c0_60 = arith.constant 0 : index
    %181 = vector.load %arg3[%c0_59, %c0_60] : memref<4x128xf32, #tpu.memory_space<vmem>>, vector<1x128xf32>
    %182 = vector.shape_cast %181 : vector<1x128xf32> to vector<128xf32>
    %183 = vector.broadcast %180 : f32 to vector<128xf32>
    %184 = arith.mulf %183, %182 : vector<128xf32>
    %185 = arith.addf %179, %184 : vector<128xf32>
    %c22 = arith.constant 22 : index
    %186 = memref.load %arg1[%c22] : memref<52xf32, #tpu.memory_space<smem>>
    %c1_61 = arith.constant 1 : index
    %c0_62 = arith.constant 0 : index
    %187 = vector.load %arg3[%c1_61, %c0_62] : memref<4x128xf32, #tpu.memory_space<vmem>>, vector<1x128xf32>
    %188 = vector.shape_cast %187 : vector<1x128xf32> to vector<128xf32>
    %189 = vector.broadcast %186 : f32 to vector<128xf32>
    %190 = arith.mulf %189, %188 : vector<128xf32>
    %191 = arith.addf %185, %190 : vector<128xf32>
    %c26 = arith.constant 26 : index
    %192 = memref.load %arg1[%c26] : memref<52xf32, #tpu.memory_space<smem>>
    %c2_63 = arith.constant 2 : index
    %c0_64 = arith.constant 0 : index
    %193 = vector.load %arg3[%c2_63, %c0_64] : memref<4x128xf32, #tpu.memory_space<vmem>>, vector<1x128xf32>
    %194 = vector.shape_cast %193 : vector<1x128xf32> to vector<128xf32>
    %195 = vector.broadcast %192 : f32 to vector<128xf32>
    %196 = arith.mulf %195, %194 : vector<128xf32>
    %197 = arith.addf %191, %196 : vector<128xf32>
    %c30 = arith.constant 30 : index
    %198 = memref.load %arg1[%c30] : memref<52xf32, #tpu.memory_space<smem>>
    %c3_65 = arith.constant 3 : index
    %c0_66 = arith.constant 0 : index
    %199 = vector.load %arg3[%c3_65, %c0_66] : memref<4x128xf32, #tpu.memory_space<vmem>>, vector<1x128xf32>
    %200 = vector.shape_cast %199 : vector<1x128xf32> to vector<128xf32>
    %201 = vector.broadcast %198 : f32 to vector<128xf32>
    %202 = arith.mulf %201, %200 : vector<128xf32>
    %203 = arith.addf %197, %202 : vector<128xf32>
    %c34 = arith.constant 34 : index
    %204 = memref.load %arg1[%c34] : memref<52xf32, #tpu.memory_space<smem>>
    %c0_67 = arith.constant 0 : index
    %c0_68 = arith.constant 0 : index
    %205 = vector.load %arg4[%c0_67, %c0_68] : memref<4x128xf32, #tpu.memory_space<vmem>>, vector<1x128xf32>
    %206 = vector.shape_cast %205 : vector<1x128xf32> to vector<128xf32>
    %207 = vector.broadcast %204 : f32 to vector<128xf32>
    %208 = arith.mulf %207, %206 : vector<128xf32>
    %209 = arith.addf %203, %208 : vector<128xf32>
    %c38 = arith.constant 38 : index
    %210 = memref.load %arg1[%c38] : memref<52xf32, #tpu.memory_space<smem>>
    %c1_69 = arith.constant 1 : index
    %c0_70 = arith.constant 0 : index
    %211 = vector.load %arg4[%c1_69, %c0_70] : memref<4x128xf32, #tpu.memory_space<vmem>>, vector<1x128xf32>
    %212 = vector.shape_cast %211 : vector<1x128xf32> to vector<128xf32>
    %213 = vector.broadcast %210 : f32 to vector<128xf32>
    %214 = arith.mulf %213, %212 : vector<128xf32>
    %215 = arith.addf %209, %214 : vector<128xf32>
    %c42 = arith.constant 42 : index
    %216 = memref.load %arg1[%c42] : memref<52xf32, #tpu.memory_space<smem>>
    %c2_71 = arith.constant 2 : index
    %c0_72 = arith.constant 0 : index
    %217 = vector.load %arg4[%c2_71, %c0_72] : memref<4x128xf32, #tpu.memory_space<vmem>>, vector<1x128xf32>
    %218 = vector.shape_cast %217 : vector<1x128xf32> to vector<128xf32>
    %219 = vector.broadcast %216 : f32 to vector<128xf32>
    %220 = arith.mulf %219, %218 : vector<128xf32>
    %221 = arith.addf %215, %220 : vector<128xf32>
    %c46 = arith.constant 46 : index
    %222 = memref.load %arg1[%c46] : memref<52xf32, #tpu.memory_space<smem>>
    %c3_73 = arith.constant 3 : index
    %c0_74 = arith.constant 0 : index
    %223 = vector.load %arg4[%c3_73, %c0_74] : memref<4x128xf32, #tpu.memory_space<vmem>>, vector<1x128xf32>
    %224 = vector.shape_cast %223 : vector<1x128xf32> to vector<128xf32>
    %225 = vector.broadcast %222 : f32 to vector<128xf32>
    %226 = arith.mulf %225, %224 : vector<128xf32>
    %227 = arith.addf %221, %226 : vector<128xf32>
    %c2_75 = arith.constant 2 : index
    %c0_76 = arith.constant 0 : index
    %228 = vector.load %arg5[%c2_75, %c0_76] : memref<4x128xf32, #tpu.memory_space<vmem>>, vector<1x128xf32>
    %229 = vector.shape_cast %228 : vector<1x128xf32> to vector<128xf32>
    %230 = vector.shape_cast %227 : vector<128xf32> to vector<1x128xf32>
    tpu.vector_store %arg5[%c2_75, %c0_76], %230 {strides = array<i32>} : memref<4x128xf32, #tpu.memory_space<vmem>>, vector<1x128xf32>,
    %c51 = arith.constant 51 : index
    %231 = memref.load %arg1[%c51] : memref<52xf32, #tpu.memory_space<smem>>
    %c3_77 = arith.constant 3 : index
    %232 = memref.load %arg1[%c3_77] : memref<52xf32, #tpu.memory_space<smem>>
    %c0_78 = arith.constant 0 : index
    %c0_79 = arith.constant 0 : index
    %233 = vector.load %arg2[%c0_78, %c0_79] : memref<4x128xf32, #tpu.memory_space<vmem>>, vector<1x128xf32>
    %234 = vector.shape_cast %233 : vector<1x128xf32> to vector<128xf32>
    %235 = vector.broadcast %232 : f32 to vector<128xf32>
    %236 = arith.mulf %235, %234 : vector<128xf32>
    %237 = vector.broadcast %231 : f32 to vector<128xf32>
    %238 = arith.addf %237, %236 : vector<128xf32>
    %c7 = arith.constant 7 : index
    %239 = memref.load %arg1[%c7] : memref<52xf32, #tpu.memory_space<smem>>
    %c1_80 = arith.constant 1 : index
    %c0_81 = arith.constant 0 : index
    %240 = vector.load %arg2[%c1_80, %c0_81] : memref<4x128xf32, #tpu.memory_space<vmem>>, vector<1x128xf32>
    %241 = vector.shape_cast %240 : vector<1x128xf32> to vector<128xf32>
    %242 = vector.broadcast %239 : f32 to vector<128xf32>
    %243 = arith.mulf %242, %241 : vector<128xf32>
    %244 = arith.addf %238, %243 : vector<128xf32>
    %c11 = arith.constant 11 : index
    %245 = memref.load %arg1[%c11] : memref<52xf32, #tpu.memory_space<smem>>
    %c2_82 = arith.constant 2 : index
    %c0_83 = arith.constant 0 : index
    %246 = vector.load %arg2[%c2_82, %c0_83] : memref<4x128xf32, #tpu.memory_space<vmem>>, vector<1x128xf32>
    %247 = vector.shape_cast %246 : vector<1x128xf32> to vector<128xf32>
    %248 = vector.broadcast %245 : f32 to vector<128xf32>
    %249 = arith.mulf %248, %247 : vector<128xf32>
    %250 = arith.addf %244, %249 : vector<128xf32>
    %c15 = arith.constant 15 : index
    %251 = memref.load %arg1[%c15] : memref<52xf32, #tpu.memory_space<smem>>
    %c3_84 = arith.constant 3 : index
    %c0_85 = arith.constant 0 : index
    %252 = vector.load %arg2[%c3_84, %c0_85] : memref<4x128xf32, #tpu.memory_space<vmem>>, vector<1x128xf32>
    %253 = vector.shape_cast %252 : vector<1x128xf32> to vector<128xf32>
    %254 = vector.broadcast %251 : f32 to vector<128xf32>
    %255 = arith.mulf %254, %253 : vector<128xf32>
    %256 = arith.addf %250, %255 : vector<128xf32>
    %c19 = arith.constant 19 : index
    %257 = memref.load %arg1[%c19] : memref<52xf32, #tpu.memory_space<smem>>
    %c0_86 = arith.constant 0 : index
    %c0_87 = arith.constant 0 : index
    %258 = vector.load %arg3[%c0_86, %c0_87] : memref<4x128xf32, #tpu.memory_space<vmem>>, vector<1x128xf32>
    %259 = vector.shape_cast %258 : vector<1x128xf32> to vector<128xf32>
    %260 = vector.broadcast %257 : f32 to vector<128xf32>
    %261 = arith.mulf %260, %259 : vector<128xf32>
    %262 = arith.addf %256, %261 : vector<128xf32>
    %c23 = arith.constant 23 : index
    %263 = memref.load %arg1[%c23] : memref<52xf32, #tpu.memory_space<smem>>
    %c1_88 = arith.constant 1 : index
    %c0_89 = arith.constant 0 : index
    %264 = vector.load %arg3[%c1_88, %c0_89] : memref<4x128xf32, #tpu.memory_space<vmem>>, vector<1x128xf32>
    %265 = vector.shape_cast %264 : vector<1x128xf32> to vector<128xf32>
    %266 = vector.broadcast %263 : f32 to vector<128xf32>
    %267 = arith.mulf %266, %265 : vector<128xf32>
    %268 = arith.addf %262, %267 : vector<128xf32>
    %c27 = arith.constant 27 : index
    %269 = memref.load %arg1[%c27] : memref<52xf32, #tpu.memory_space<smem>>
    %c2_90 = arith.constant 2 : index
    %c0_91 = arith.constant 0 : index
    %270 = vector.load %arg3[%c2_90, %c0_91] : memref<4x128xf32, #tpu.memory_space<vmem>>, vector<1x128xf32>
    %271 = vector.shape_cast %270 : vector<1x128xf32> to vector<128xf32>
    %272 = vector.broadcast %269 : f32 to vector<128xf32>
    %273 = arith.mulf %272, %271 : vector<128xf32>
    %274 = arith.addf %268, %273 : vector<128xf32>
    %c31 = arith.constant 31 : index
    %275 = memref.load %arg1[%c31] : memref<52xf32, #tpu.memory_space<smem>>
    %c3_92 = arith.constant 3 : index
    %c0_93 = arith.constant 0 : index
    %276 = vector.load %arg3[%c3_92, %c0_93] : memref<4x128xf32, #tpu.memory_space<vmem>>, vector<1x128xf32>
    %277 = vector.shape_cast %276 : vector<1x128xf32> to vector<128xf32>
    %278 = vector.broadcast %275 : f32 to vector<128xf32>
    %279 = arith.mulf %278, %277 : vector<128xf32>
    %280 = arith.addf %274, %279 : vector<128xf32>
    %c35 = arith.constant 35 : index
    %281 = memref.load %arg1[%c35] : memref<52xf32, #tpu.memory_space<smem>>
    %c0_94 = arith.constant 0 : index
    %c0_95 = arith.constant 0 : index
    %282 = vector.load %arg4[%c0_94, %c0_95] : memref<4x128xf32, #tpu.memory_space<vmem>>, vector<1x128xf32>
    %283 = vector.shape_cast %282 : vector<1x128xf32> to vector<128xf32>
    %284 = vector.broadcast %281 : f32 to vector<128xf32>
    %285 = arith.mulf %284, %283 : vector<128xf32>
    %286 = arith.addf %280, %285 : vector<128xf32>
    %c39 = arith.constant 39 : index
    %287 = memref.load %arg1[%c39] : memref<52xf32, #tpu.memory_space<smem>>
    %c1_96 = arith.constant 1 : index
    %c0_97 = arith.constant 0 : index
    %288 = vector.load %arg4[%c1_96, %c0_97] : memref<4x128xf32, #tpu.memory_space<vmem>>, vector<1x128xf32>
    %289 = vector.shape_cast %288 : vector<1x128xf32> to vector<128xf32>
    %290 = vector.broadcast %287 : f32 to vector<128xf32>
    %291 = arith.mulf %290, %289 : vector<128xf32>
    %292 = arith.addf %286, %291 : vector<128xf32>
    %c43 = arith.constant 43 : index
    %293 = memref.load %arg1[%c43] : memref<52xf32, #tpu.memory_space<smem>>
    %c2_98 = arith.constant 2 : index
    %c0_99 = arith.constant 0 : index
    %294 = vector.load %arg4[%c2_98, %c0_99] : memref<4x128xf32, #tpu.memory_space<vmem>>, vector<1x128xf32>
    %295 = vector.shape_cast %294 : vector<1x128xf32> to vector<128xf32>
    %296 = vector.broadcast %293 : f32 to vector<128xf32>
    %297 = arith.mulf %296, %295 : vector<128xf32>
    %298 = arith.addf %292, %297 : vector<128xf32>
    %c47 = arith.constant 47 : index
    %299 = memref.load %arg1[%c47] : memref<52xf32, #tpu.memory_space<smem>>
    %c3_100 = arith.constant 3 : index
    %c0_101 = arith.constant 0 : index
    %300 = vector.load %arg4[%c3_100, %c0_101] : memref<4x128xf32, #tpu.memory_space<vmem>>, vector<1x128xf32>
    %301 = vector.shape_cast %300 : vector<1x128xf32> to vector<128xf32>
    %302 = vector.broadcast %299 : f32 to vector<128xf32>
    %303 = arith.mulf %302, %301 : vector<128xf32>
    %304 = arith.addf %298, %303 : vector<128xf32>
    %c3_102 = arith.constant 3 : index
    %c0_103 = arith.constant 0 : index
    %305 = vector.load %arg5[%c3_102, %c0_103] : memref<4x128xf32, #tpu.memory_space<vmem>>, vector<1x128xf32>
    %306 = vector.shape_cast %305 : vector<1x128xf32> to vector<128xf32>
    %307 = vector.shape_cast %304 : vector<128xf32> to vector<1x128xf32>
    tpu.vector_store %arg5[%c3_102, %c0_103], %307 {strides = array<i32>} : memref<4x128xf32, #tpu.memory_space<vmem>>, vector<1x128xf32>,
    return
  }
  func.func @transform_0(%arg0: i32) -> i32 {
    %c0_i32 = arith.constant 0 : i32
    %c0_i32_0 = arith.constant 0 : i32
    return %c0_i32 : i32
  }
  func.func @transform_1(%arg0: i32) -> (i32, i32) {
    %c0_i32 = arith.constant 0 : i32
    %c0_i32_0 = arith.constant 0 : i32
    return %c0_i32, %arg0 : i32, i32
  }
  func.func @transform_2(%arg0: i32) -> (i32, i32) {
    %c0_i32 = arith.constant 0 : i32
    %c0_i32_0 = arith.constant 0 : i32
    return %c0_i32, %arg0 : i32, i32
  }
  func.func @transform_3(%arg0: i32) -> (i32, i32) {
    %c0_i32 = arith.constant 0 : i32
    %c0_i32_0 = arith.constant 0 : i32
    return %c0_i32, %arg0 : i32, i32
  }
  func.func @transform_4(%arg0: i32) -> (i32, i32) {
    %c0_i32 = arith.constant 0 : i32
    %c0_i32_0 = arith.constant 0 : i32
    return %c0_i32, %arg0 : i32, i32
  }
}

</mosaic_0001>

<bundles_post_ra>
// kernel: squeeze.7
= control target key start
LH: loop header
LB: loop body
LE: loop exit
PB: predicated region body
PF: predicated region fallthrough
CT: control target
= control target key end

     0   :  { %s15_s6 = smov 3  ;;  %s18_s7 = smov 12  ;;  %vm20_vm0 = vcmask 1043458   ;;  %vm25_vm1 = vcmask 1045508   ;;  %vm30_vm2 = vcmask 1047558   ;;  %vm4_vm3 = vcmask 1047556   ;;  %s364_s0 = inlined_call_operand.vmem [shape: f32[1,4,16,16], index: 0, kind: input, shape index: {}]   ;;  %s365_s1 = inlined_call_operand.vmem [shape: f32[4,256], index: 1, kind: output, shape index: {}]  }
   0x1   :  { %v193_v0 = vld [vmem:[%s364_s0 + $0x7] ss:$16 sm:%s15_s6]   ;;  %s23_s12 = smov 48  ;;  %s28_s13 = smov 192  ;;  %vm6_vm4 = vcmask 130048   ;;  %vm34_vm5 = vcmask 1048448  }
   0x2   :  { %v194_v1 = vld [vmem:[%s364_s0 + $0x7] ss:$16 sm:%s18_s7]   ;;  %v195_v3 = vld [vmem:[%s364_s0 - $0x31] ss:$16 sm:%s23_s12]   ;;  %s63_s18 = smov 3  ;;  %s66_s21 = smov 12 }
   0x3   :  { %v21_v2 = vsel %vm20_vm0, %v194_v1, %v193_v0  ;;  %v196_v4 = vld [vmem:[%s364_s0 - $0x31] ss:$16 sm:%s28_s13]   ;;  %v201_v6 = vld [vmem:[%s364_s0 + $0x5] ss:$16 sm:%s63_s18]   ;;  %s71_s22 = smov 48  ;;  %s76_s27 = smov 192 }
   0x4   :  { %v26_v5 = vsel %vm25_vm1, %v195_v3, %v21_v2  ;;  %v202_v8 = vld [vmem:[%s364_s0 + $0x5] ss:$16 sm:%s66_s21]   ;;  %v203_v9 = vld [vmem:[%s364_s0 - $0x33] ss:$16 sm:%s71_s22]   ;;  %s229_s28 = smov 112   ;;  %s39_s2 = smov 3 }
   0x5   :  { %v31_v7 = vsel %vm30_vm2, %v196_v4, %v26_v5  ;;  %v69_v10 = vsel %vm20_vm0, %v202_v8, %v201_v6  ;;  %v204_v11 = vld [vmem:[%s364_s0 - $0x33] ss:$16 sm:%s76_s27]   ;;  %s42_s3 = smov 12  ;;  %v197_v13 = vld [vmem:[%s364_s0 + $0x6] ss:$16 sm:%s39_s2]   ;;  %s47_s8 = smov 48 }
   0x6   :  { %32 = vrot.lane.b32.xlu0 %v31_v7, %s229_s28  ;;  %v74_v12 = vsel %vm25_vm1, %v203_v9, %v69_v10  ;;  %v198_v14 = vld [vmem:[%s364_s0 + $0x6] ss:$16 sm:%s42_s3]   ;;  %s52_s9 = smov 192  ;;  %s87_s14 = smov 3  ;;  %vm58_vm6 = vcmask 917248   ;;  %vm82_vm7 = vcmask 786048  }
   0x7   :  { %v79_v15 = vsel %vm30_vm2, %v204_v11, %v74_v12  ;;  %v45_v16 = vsel %vm20_vm0, %v198_v14, %v197_v13  ;;  %v199_v17 = vld [vmem:[%s364_s0 - $0x32] ss:$16 sm:%s47_s8]   ;;  %s230_s15 = smov 80   ;;  %v205_v20 = vld [vmem:[%s364_s0 + $0x4] ss:$16 sm:%s87_s14]   ;;  %s90_s18 = smov 12 }
   0x8   :  { %v200_v18 = vld [vmem:[%s364_s0 - $0x32] ss:$16 sm:%s52_s9]   ;;  %80 = vrot.lane.b32.xlu1 %v79_v15, %s230_s15  ;;  %v50_v19 = vsel %vm25_vm1, %v199_v17, %v45_v16  ;;  %s95_s19 = smov 48  ;;  %s100_s24 = smov 192  ;;  %vm106_vm8 = vcmask 654848   ;;  %vm130_vm9 = vcmask 523648  }
   0x9   :  { %v55_v21 = vsel %vm30_vm2, %v200_v18, %v50_v19  ;;  %v206_v22 = vld [vmem:[%s364_s0 + $0x4] ss:$16 sm:%s90_s18]   ;;  %v207_v23 = vld [vmem:[%s364_s0 - $0x34] ss:$16 sm:%s95_s19]   ;;  %s231_s25 = smov 96   ;;  %s111_s28 = smov 3 }
   0xa   :  { %56 = vrot.lane.b32.xlu0 %v55_v21, %s231_s25  ;;  %v93_v24 = vsel %vm20_vm0, %v206_v22, %v205_v20  ;;  %v208_v25 = vld [vmem:[%s364_s0 - $0x34] ss:$16 sm:%s100_s24]   ;;  %s114_s29 = smov 12  ;;  %s119_s5 = smov 48  ;;  %vm154_vm10 = vcmask 392448   ;;  %vm178_vm11 = vcmask 261248  }
   0xb   :  { %v98_v26 = vsel %vm25_vm1, %v207_v23, %v93_v24  ;;  %v209_v27 = vld [vmem:[%s364_s0 + $0x3] ss:$16 sm:%s111_s28]   ;;  %s124_s6 = smov 192  ;;  %v211_v31 = vld [vmem:[%s364_s0 - $0x35] ss:$16 sm:%s119_s5]   ;;  %s135_s11 = smov 3 }
   0xc   :  { %v210_v28 = vld [vmem:[%s364_s0 + $0x3] ss:$16 sm:%s114_s29]   ;;  %v103_v29 = vsel %vm30_vm2, %v208_v25, %v98_v26  ;;  %v212_v32 = vld [vmem:[%s364_s0 - $0x35] ss:$16 sm:%s124_s6]   ;;  %s232_s12 = smov 64   ;;  %s138_s15 = smov 12 }
   0xd   :  { %v117_v30 = vsel %vm20_vm0, %v210_v28, %v209_v27  ;;  %104 = vrot.lane.b32.xlu1 %v103_v29, %s232_s12  ;;  %v213_v34 = vld [vmem:[%s364_s0 + $0x2] ss:$16 sm:%s135_s11]   ;;  %s143_s16 = smov 48  ;;  %s148_s21 = smov 192 }
   0xe   :  { %v122_v33 = vsel %vm25_vm1, %v211_v31, %v117_v30  ;;  %v214_v36 = vld [vmem:[%s364_s0 + $0x2] ss:$16 sm:%s138_s15]   ;;  %v215_v37 = vld [vmem:[%s364_s0 - $0x36] ss:$16 sm:%s143_s16]   ;;  %s233_s22 = smov 48   ;;  %s159_s25 = smov 3 }
   0xf   :  { %v127_v35 = vsel %vm30_vm2, %v212_v32, %v122_v33  ;;  %v141_v38 = vsel %vm20_vm0, %v214_v36, %v213_v34  ;;  %v216_v39 = vld [vmem:[%s364_s0 - $0x36] ss:$16 sm:%s148_s21]   ;;  %s162_s26 = smov 12  ;;  %v217_v41 = vld [vmem:[%s364_s0 + $0x1] ss:$16 sm:%s159_s25]   ;;  %s167_s2 = smov 48 }
  0x10   :  { %128 = vrot.lane.b32.xlu0 %v127_v35, %s233_s22  ;;  %v146_v40 = vsel %vm25_vm1, %v215_v37, %v141_v38  ;;  %v218_v42 = vld [vmem:[%s364_s0 + $0x1] ss:$16 sm:%s162_s26]   ;;  %s172_s3 = smov 192  ;;  %s234_s8 = smov 32  }
  0x11   :  { %v151_v43 = vsel %vm30_vm2, %v216_v39, %v146_v40  ;;  %v165_v44 = vsel %vm20_vm0, %v218_v42, %v217_v41  ;;  %v219_v45 = vld [vmem:[%s364_s0 - $0x37] ss:$16 sm:%s167_s2]   ;;  %v2_v48 = vld [vmem:[%s364_s0] ss:$8 sm:$0xf]  }
  0x12   :  { %v220_v46 = vld [vmem:[%s364_s0 - $0x37] ss:$16 sm:%s172_s3]   ;;  %152 = vrot.lane.b32.xlu1 %v151_v43, %s234_s8  ;;  %v170_v47 = vsel %vm25_vm1, %v219_v45, %v165_v44  ;;  %v3_v49 = vld [vmem:[%s364_s0] ss:$8 sm:$0xf0]   ;;  %s235_s0 = smov 16  }
  0x13   :  { %v175_v50 = vsel %vm30_vm2, %v220_v46, %v170_v47  ;;  %v5_v51 = vsel %vm4_vm3, %v3_v49, %v2_v48 }
  0x14   :  { %176 = vrot.lane.b32.xlu0 %v175_v50, %s235_s0  ;;  %7 = vst.msk [vmem:[#allocation0] ss:$8 sm:$0x3] %vm6_vm4, %v5_v51   ;;  %9 = vst.msk [vmem:[#allocation0 - $0xf] ss:$8 sm:$0xc] %vm6_vm4, %v5_v51  }
  0x15   :  { %11 = vst.msk [vmem:[#allocation0 - $0x1e] ss:$8 sm:$0x30] %vm6_vm4, %v5_v51   ;;  %13 = vst.msk [vmem:[#allocation0 - $0x2d] ss:$8 sm:$0xc0] %vm6_vm4, %v5_v51  }
  0x78   :  { %v33_v52 = vpop.permute.xlu0 %32  }
  0x79   :  { %35 = vst.msk [vmem:[#allocation0] sm:$0xf] %vm34_vm5, %v33_v52   ;;  %37 = vst.msk [vmem:[#allocation0 + $0x4] sm:$0xf0] %vm34_vm5, %v33_v52  }
  0x7a   :  { %v81_v53 = vpop.permute.xlu1 %80  }
  0x7c   :  { %v57_v54 = vpop.permute.xlu0 %56  }
  0x7d   :  { %59 = vst.msk [vmem:[#allocation0] sm:$0xf] %vm58_vm6, %v57_v54   ;;  %61 = vst.msk [vmem:[#allocation0 + $0x4] sm:$0xf0] %vm58_vm6, %v57_v54  }
  0x7e   :  { %83 = vst.msk [vmem:[#allocation0] sm:$0xf] %vm82_vm7, %v81_v53   ;;  %85 = vst.msk [vmem:[#allocation0 + $0x4] sm:$0xf0] %vm82_vm7, %v81_v53  }
  0x7f   :  { %v105_v55 = vpop.permute.xlu1 %104  }
  0x80   :  { %107 = vst.msk [vmem:[#allocation0] sm:$0xf] %vm106_vm8, %v105_v55   ;;  %109 = vst.msk [vmem:[#allocation0 + $0x4] sm:$0xf0] %vm106_vm8, %v105_v55  }
  0x82   :  { %v129_v56 = vpop.permute.xlu0 %128  }
  0x83   :  { %131 = vst.msk [vmem:[#allocation0] sm:$0xf] %vm130_vm9, %v129_v56   ;;  %133 = vst.msk [vmem:[#allocation0 + $0x4] sm:$0xf0] %vm130_vm9, %v129_v56  }
  0x84   :  { %v153_v57 = vpop.permute.xlu1 %152  }
  0x85   :  { %155 = vst.msk [vmem:[#allocation0] sm:$0xf] %vm154_vm10, %v153_v57   ;;  %157 = vst.msk [vmem:[#allocation0 + $0x4] sm:$0xf0] %vm154_vm10, %v153_v57  }
  0x86   :  { %v177_v58 = vpop.permute.xlu0 %176  }
  0x87   :  { %179 = vst.msk [vmem:[#allocation0] sm:$0xf] %vm178_vm11, %v177_v58   ;;  %181 = vst.msk [vmem:[#allocation0 + $0x4] sm:$0xf0] %vm178_vm11, %v177_v58  }
  0x8e   :  { %v185_v59 = vld [vmem:[#allocation0] sm:$0xf]  ;;  %v189_v60 = vld [vmem:[#allocation0 + $0x8] sm:$0xf] }
  0x8f   :  { %187 = vst [vmem:[%s365_s1] sm:$0xf] %v185_v59  ;;  %221 = vst [vmem:[%s365_s1 + $0x4] sm:$0xf] %v189_v60 }

// kernel: cfg_denoise.1
= control target key start
LH: loop header
LB: loop body
LE: loop exit
PB: predicated region body
PF: predicated region fallthrough
CT: control target
= control target key end

     0   :  { %9 = vsyncpa [#allocation3], 0  ;;  %s718_s15 = smov 0   ;;  %s956_s0 = inlined_call_operand.vmem [shape: f32[52], index: 0, kind: input, shape index: {}]   ;;  %s957_s1 = inlined_call_operand.vmem [shape: f32[4,256], index: 1, kind: input, shape index: {}]   ;;  %s958_s2 = inlined_call_operand.vmem [shape: f32[4,256], index: 2, kind: input, shape index: {}]   ;;  %s959_s3 = inlined_call_operand.vmem [shape: f32[4,256], index: 3, kind: input, shape index: {}]   ;;  %s960_s4 = inlined_call_operand.vmem [shape: f32[4,256], index: 4, kind: output, shape index: {}]  }
   0x1 LB: > { %s582_s16 = sadd.s32 4294967295, %s690_s15   ;;  %p584_p0 = scmp.ge.s32.totalorder %s690_s15, 1  ;;  %s690_s15 = sphi %s718_s15, %s15_s15  }
   0x2   : > { %p145_p1 = scmp.lt.s32.totalorder %s690_s15, 3  ;;  %s158_s19 = sshll.u32 %s956_s0, 4  ;;  %s159_s19 = int_to_ptr.vmem [resolvable:$true] %s158_s19 }
   0x3   : > { %p654_p3 = scmp.eq.s32.totalorder %s582_s16, 0  ;;  %s665_s21 = scalar_lea.vmem %s159_s19, 16 }
   0x4   : > { %p729_p2 = pnand %p584_p0, %p145_p1  ;;  %p666_p6 = scmp.ne.s32.totalorder %s159_s19, %s665_s21 }
   0x5   : > { %p673_p10 = scmp.lt.s32.totalorder %s159_s19, %s159_s19  ;;  %p674_p11 = scmp.lt.s32.totalorder %s665_s21, %s665_s21 }
   0x6   : > { %p650_p4 = pneg %p729_p2 }
   0x7   : > { %p675_p12 = por %p674_p11, %p673_p10 }
   0x8   : > { %p651_p5 = pnand %p654_p3, %p650_p4 }
   0xa   : > { %p667_p7 = pneg %p651_p5 }
   0xc   : > { %p668_p8 = pnand %p667_p7, %p666_p6 }
   0xe   : > { %p669_p9 = pneg %p668_p8 }
  0x10   : > { %p676_p13 = pnand %p675_p12, %p669_p9 }
  0x12   : > { %679 = shalt.err (!%p676_p13)
}
  0x13   : > { %s692_s22 = smov [#allocation2]   ;;  %192 = sbr.rel (%p729_p2) target bundleno = 87 (0x57), region = 36 }
  0x14   : > { %653 = dma.vmem_to_smem (!%p651_p5), %s159_s19, 16, %s692_s22, [#allocation3]  }
  0x1a   : > { %685 = dma.done.wait (%p654_p3), [#allocation3], 16  }
  0x1b   : > { %687 = vsyncadd (%p654_p3), [#allocation3], 4294967280 }
  0x1c   : > { %198 = sfence }
  0x1d   : > { %p225_p0 = scmp.lt.s32.totalorder %s582_s16, 1  ;;  %s593_s23 = sld [smem:[#allocation2 + $0x30]] }
  0x1e   : > { %s242_s24 = sld [smem:[#allocation2]]  ;;  %s594_s25 = sld [smem:[#allocation2 + $0x4]] }
  0x1f   : > { %s963_s16 = smov (!%p225_p0, %s582_s16), 1  ;;  %s595_s26 = sld [smem:[#allocation2 + $0x8]] }
  0x20   : > { %s596_s27 = sld [smem:[#allocation2 + $0xc]]  ;;  %s740_s28 = sshll.u32 %s963_s16, 2 }
  0x21   : > { %s742_s29 = sld [smem:[#allocation2 + $0x10]]  ;;  %s748_s6 = scalar_lea.vmem %s957_s1, %s740_s28 }
  0x22   : > { %v243_v0 = vld [vmem:[%s748_s6] sm:$0x1]  ;;  %v249_v1 = vld [vmem:[%s748_s6 + $0x1] sm:$0x1]  ;;  %v254_v5 = vld [vmem:[%s748_s6 + $0x2] sm:$0x1]  ;;  %s759_s10 = scalar_lea.vmem %s958_s2, %s740_s28  ;;  %s770_s16 = scalar_lea.vmem %s959_s3, %s740_s28 }
  0x23   : > { %v246_v3 = vstv %s593_s23  ;;  %s753_s7 = sld [smem:[#allocation2 + $0x14]]  ;;  %s761_s11 = sld [smem:[#allocation2 + $0x18]]  ;;  %v259_v9 = vld [vmem:[%s748_s6 + $0x3] sm:$0x1]  ;;  %v264_v13 = vld [vmem:[%s759_s10] sm:$0x1] }
  0x24   : > { %v244_v2 = vstv %s242_s24  ;;  %v250_v4 = vstv %s594_s25  ;;  %s764_s12 = sld [smem:[#allocation2 + $0x1c]]  ;;  %s772_s17 = sld [smem:[#allocation2 + $0x20]]  ;;  %v269_v17 = vld [vmem:[%s759_s10 + $0x1] sm:$0x1]  ;;  %v274_v21 = vld [vmem:[%s759_s10 + $0x2] sm:$0x1] }
  0x25   : > { %v245_v6 = vmul.f32 %v244_v2, %v243_v0  ;;  %v251_v7 = vmul.f32 %v250_v4, %v249_v1  ;;  %v255_v8 = vstv %s595_s26  ;;  %s776_s18 = sld [smem:[#allocation2 + $0x24]]  ;;  %s778_s19 = sld [smem:[#allocation2 + $0x28]]  ;;  %v279_v25 = vld [vmem:[%s759_s10 + $0x3] sm:$0x1]  ;;  %v306_v27 = vld [vmem:[%s748_s6] sm:$0x1] }
  0x26   : > { %v260_v10 = vstv %s596_s27  ;;  %v256_v12 = vmul.f32 %v255_v8, %v254_v5  ;;  %s780_s20 = sld [smem:[#allocation2 + $0x31]]  ;;  %s784_s22 = sld [smem:[#allocation2 + $0x2c]]  ;;  %v284_v28 = vld [vmem:[%s770_s16] sm:$0x1]  ;;  %v312_v29 = vld [vmem:[%s748_s6 + $0x1] sm:$0x1] }
  0x27   : > { %v247_v11 = vadd.f32 %v246_v3, %v245_v6  ;;  %v265_v14 = vstv %s742_s29  ;;  %v261_v16 = vmul.f32 %v260_v10, %v259_v9  ;;  %s606_s21 = sld [smem:[#allocation2 + $0x1]]  ;;  %s786_s23 = sld [smem:[#allocation2 + $0x5]]  ;;  %v317_v34 = vld [vmem:[%s748_s6 + $0x2] sm:$0x1]  ;;  %v289_v36 = vld [vmem:[%s770_s16 + $0x1] sm:$0x1] }
  0x28   : > { %v266_v20 = vmul.f32 %v265_v14, %v264_v13  ;;  %s788_s24 = sld [smem:[#allocation2 + $0x9]]  ;;  %s790_s25 = sld [smem:[#allocation2 + $0xd]]  ;;  %v294_v41 = vld [vmem:[%s770_s16 + $0x2] sm:$0x1]  ;;  %v322_v44 = vld [vmem:[%s748_s6 + $0x3] sm:$0x1] }
  0x29   : > { %v252_v15 = vadd.f32 %v251_v7, %v247_v11  ;;  %v270_v18 = vstv %s753_s7  ;;  %v275_v22 = vstv %s761_s11  ;;  %s794_s26 = sld [smem:[#allocation2 + $0x11]]  ;;  %s799_s27 = sld [smem:[#allocation2 + $0x15]]  ;;  %v299_v48 = vld [vmem:[%s770_s16 + $0x3] sm:$0x1]  ;;  %v327_v54 = vld [vmem:[%s759_s10] sm:$0x1] }
  0x2a   : > { %v271_v24 = vmul.f32 %v270_v18, %v269_v17  ;;  %v280_v26 = vstv %s764_s12  ;;  %v276_v31 = vmul.f32 %v275_v22, %v274_v21  ;;  %v285_v32 = vstv %s772_s17  ;;  %s805_s29 = sld [smem:[#allocation2 + $0x19]]  ;;  %s807_s30 = sld [smem:[#allocation2 + $0x1d]]  ;;  %v332_v58 = vld [vmem:[%s759_s10 + $0x1] sm:$0x1]  ;;  %v369_v2 = vld [vmem:[%s748_s6] sm:$0x1] }
  0x2b   : > { %v257_v19 = vadd.f32 %v256_v12, %v252_v15  ;;  %v281_v35 = vmul.f32 %v280_v26, %v279_v25  ;;  %s812_s5 = sld [smem:[#allocation2 + $0x21]]  ;;  %s818_s7 = sld [smem:[#allocation2 + $0x25]]  ;;  %v286_v46 = vmul.f32 %v285_v32, %v284_v28  ;;  %v290_v47 = vstv %s776_s18  ;;  %v375_v3 = vld [vmem:[%s748_s6 + $0x1] sm:$0x1]  ;;  %v337_v6 = vld [vmem:[%s759_s10 + $0x2] sm:$0x1] }
  0x2c   : > { %v309_v38 = vstv %s780_s20  ;;  %s820_s8 = sld [smem:[#allocation2 + $0x32]]  ;;  %s826_s11 = sld [smem:[#allocation2 + $0x6]]  ;;  %v295_v52 = vstv %s778_s19  ;;  %v300_v53 = vstv %s784_s22  ;;  %v291_v61 = vmul.f32 %v290_v47, %v289_v36  ;;  %v342_v8 = vld [vmem:[%s759_s10 + $0x3] sm:$0x1] }
  0x2d   : > { %v262_v23 = vadd.f32 %v261_v16, %v257_v19  ;;  %v307_v33 = vstv %s606_s21  ;;  %v313_v39 = vstv %s786_s23  ;;  %s824_s9 = sld [smem:[#allocation2 + $0x2]]  ;;  %s832_s12 = sld [smem:[#allocation2 + $0x29]]  ;;  %v296_v62 = vmul.f32 %v295_v52, %v294_v41  ;;  %v380_v14 = vld [vmem:[%s748_s6 + $0x2] sm:$0x1]  ;;  %v347_v16 = vld [vmem:[%s770_s16] sm:$0x1] }
  0x2e   : > { %v308_v37 = vmul.f32 %v307_v33, %v306_v27  ;;  %v314_v42 = vmul.f32 %v313_v39, %v312_v29  ;;  %v318_v43 = vstv %s788_s24  ;;  %v323_v45 = vstv %s790_s25  ;;  %s834_s13 = sld [smem:[#allocation2 + $0xa]]  ;;  %s838_s14 = sld [smem:[#allocation2 + $0xe]]  ;;  %v352_v17 = vld [vmem:[%s770_s16 + $0x1] sm:$0x1]  ;;  %v357_v28 = vld [vmem:[%s770_s16 + $0x2] sm:$0x1] }
  0x2f   : > { %v267_v30 = vadd.f32 %v266_v20, %v262_v23  ;;  %v319_v50 = vmul.f32 %v318_v43, %v317_v34  ;;  %v328_v55 = vstv %s794_s26  ;;  %v324_v57 = vmul.f32 %v323_v45, %v322_v44  ;;  %s840_s17 = sld [smem:[#allocation2 + $0x12]]  ;;  %s842_s18 = sld [smem:[#allocation2 + $0x16]]  ;;  %v390_v34 = vld [vmem:[%s759_s10] sm:$0x1]  ;;  %v395_v39 = vld [vmem:[%s759_s10 + $0x1] sm:$0x1] }
  0x30   : > { %v310_v49 = vadd.f32 %v309_v38, %v308_v37  ;;  %v333_v59 = vstv %s799_s27  ;;  %v301_v63 = vmul.f32 %v300_v53, %v299_v48  ;;  %v329_v1 = vmul.f32 %v328_v55, %v327_v54  ;;  %s846_s19 = sld [smem:[#allocation2 + $0x1a]]  ;;  %s852_s20 = sld [smem:[#allocation2 + $0x2d]]  ;;  %v400_v41 = vld [vmem:[%s759_s10 + $0x2] sm:$0x1]  ;;  %v438_v55 = vld [vmem:[%s748_s6 + $0x1] sm:$0x1] }
  0x31   : > { %v272_v40 = vadd.f32 %v271_v24, %v267_v30  ;;  %v334_v5 = vmul.f32 %v333_v59, %v332_v58  ;;  %v338_v7 = vstv %s805_s29  ;;  %v343_v9 = vstv %s807_s30  ;;  %s858_s21 = sld [smem:[#allocation2 + $0x1e]]  ;;  %s864_s24 = scalar_lea.vmem %s960_s4, %s740_s28  ;;  %v385_v24 = vld [vmem:[%s748_s6 + $0x3] sm:$0x1] }
  0x32   : > { %v315_v56 = vadd.f32 %v314_v42, %v310_v49  ;;  %v372_v12 = vstv %s820_s8  ;;  %v376_v13 = vstv %s826_s11  ;;  %s869_s25 = sld [smem:[#allocation2 + $0x22]]  ;;  %v339_v22 = vmul.f32 %v338_v7, %v337_v6  ;;  %s874_s28 = sld [smem:[#allocation2 + $0x33]] }
  0x33   : > { %v277_v51 = vadd.f32 %v276_v31, %v272_v40  ;;  %v370_v11 = vstv %s824_s9  ;;  %v377_v19 = vmul.f32 %v376_v13, %v375_v3  ;;  %v348_v23 = vstv %s812_s5  ;;  %s876_s26 = sld [smem:[#allocation2 + $0x3]]  ;;  %s880_s27 = sld [smem:[#allocation2 + $0x7]] }
  0x34   : > { %v320_v0 = vadd.f32 %v319_v50, %v315_v56  ;;  %v371_v18 = vmul.f32 %v370_v11, %v369_v2  ;;  %v381_v20 = vstv %s834_s13  ;;  %v386_v25 = vstv %s838_s14  ;;  %s882_s29 = sld [smem:[#allocation2 + $0xb]]  ;;  %s887_s30 = sld [smem:[#allocation2 + $0xf]]  ;;  %v443_v56 = vld [vmem:[%s748_s6 + $0x2] sm:$0x1]  ;;  %v448_v2 = vld [vmem:[%s748_s6 + $0x3] sm:$0x1] }
  0x35   : > { %v282_v60 = vadd.f32 %v281_v35, %v277_v51  ;;  %v353_v27 = vstv %s818_s7  ;;  %v382_v30 = vmul.f32 %v381_v20, %v380_v14  ;;  %v344_v32 = vmul.f32 %v343_v9, %v342_v8  ;;  %s889_s5 = sld [smem:[#allocation2 + $0x13]]  ;;  %s895_s7 = sld [smem:[#allocation2 + $0x26]] }
  0x36   : > { %v325_v10 = vadd.f32 %v324_v57, %v320_v0  ;;  %v373_v29 = vadd.f32 %v372_v12, %v371_v18  ;;  %v358_v33 = vstv %s832_s12  ;;  %v391_v35 = vstv %s840_s17  ;;  %s898_s8 = sld [smem:[#allocation2 + $0x17]]  ;;  %s902_s9 = sld [smem:[#allocation2 + $0x2a]]  ;;  %v362_v57 = vld [vmem:[%s770_s16 + $0x3] sm:$0x1]  ;;  %v453_v12 = vld [vmem:[%s759_s10] sm:$0x1] }
  0x37   : > { %v287_v4 = vadd.f32 %v286_v46, %v282_v60  ;;  %v387_v38 = vmul.f32 %v386_v25, %v385_v24  ;;  %v396_v40 = vstv %s842_s18  ;;  %v349_v43 = vmul.f32 %v348_v23, %v347_v16  ;;  %v432_v46 = vld [vmem:[%s748_s6] sm:$0x1]  ;;  %s908_s11 = sld [smem:[#allocation2 + $0x1b]]  ;;  %v405_v60 = vld [vmem:[%s759_s10 + $0x3] sm:$0x1]  ;;  %s913_s12 = sld [smem:[#allocation2 + $0x2e]] }
  0x38   : > { %v330_v21 = vadd.f32 %v329_v1, %v325_v10  ;;  %v378_v37 = vadd.f32 %v377_v19, %v373_v29  ;;  %v354_v44 = vmul.f32 %v353_v27, %v352_v17  ;;  %v401_v45 = vstv %s846_s19  ;;  %s919_s13 = sld [smem:[#allocation2 + $0x1f]]  ;;  %v410_v10 = vld [vmem:[%s770_s16] sm:$0x1]  ;;  %s925_s14 = sld [smem:[#allocation2 + $0x23]]  ;;  %v415_v19 = vld [vmem:[%s770_s16 + $0x1] sm:$0x1] }
  0x39   : > { %v292_v15 = vadd.f32 %v291_v61, %v287_v4  ;;  %v359_v47 = vmul.f32 %v358_v33, %v357_v28  ;;  %v363_v48 = vstv %s852_s20  ;;  %v392_v50 = vmul.f32 %v391_v35, %v390_v34  ;;  %s931_s6 = sld [smem:[#allocation2 + $0x27]]  ;;  %v420_v28 = vld [vmem:[%s770_s16 + $0x2] sm:$0x1]  ;;  %s937_s17 = sld [smem:[#allocation2 + $0x2b]] }
  0x3a   : > { %v335_v31 = vadd.f32 %v334_v5, %v330_v21  ;;  %v383_v49 = vadd.f32 %v382_v30, %v378_v37  ;;  %v397_v52 = vmul.f32 %v396_v40, %v395_v39  ;;  %v406_v53 = vstv %s858_s21  ;;  %v458_v21 = vld [vmem:[%s759_s10 + $0x1] sm:$0x1]  ;;  %v463_v30 = vld [vmem:[%s759_s10 + $0x2] sm:$0x1]  ;;  %s643_s18 = sld [smem:[#allocation2 + $0x2f]] }
  0x3b   : > { %v297_v26 = vadd.f32 %v296_v62, %v292_v15  ;;  %v433_v54 = vstv %s876_s26  ;;  %v402_v59 = vmul.f32 %v401_v45, %v400_v41  ;;  %v435_v62 = vstv %s874_s28 }
  0x3c   : > { %v340_v42 = vadd.f32 %v339_v22, %v335_v31  ;;  %v388_v58 = vadd.f32 %v387_v38, %v383_v49  ;;  %v434_v61 = vmul.f32 %v433_v54, %v432_v46  ;;  %v439_v0 = vstv %s880_s27  ;;  %v468_v38 = vld [vmem:[%s759_s10 + $0x3] sm:$0x1] }
  0x3d   : > { %v302_v36 = vadd.f32 %v301_v63, %v297_v26  ;;  %v444_v1 = vstv %s882_s29  ;;  %v449_v3 = vstv %s887_s30  ;;  %v440_v6 = vmul.f32 %v439_v0, %v438_v55  ;;  %v483_v55 = vld [vmem:[%s770_s16 + $0x2] sm:$0x1] }
  0x3e   : > { %v345_v51 = vadd.f32 %v344_v32, %v340_v42  ;;  %v393_v4 = vadd.f32 %v392_v50, %v388_v58  ;;  %v436_v5 = vadd.f32 %v435_v62, %v434_v61  ;;  %v445_v7 = vmul.f32 %v444_v1, %v443_v56  ;;  %v478_v50 = vld [vmem:[%s770_s16 + $0x1] sm:$0x1] }
  0x3f   : > { %303 = vst [vmem:[%s864_s24] sm:$0x1] %v302_v36  ;;  %v364_v9 = vmul.f32 %v363_v48, %v362_v57  ;;  %v411_v11 = vstv %s869_s25  ;;  %v454_v13 = vstv %s889_s5  ;;  %v407_v15 = vmul.f32 %v406_v53, %v405_v60  ;;  %v425_v36 = vld [vmem:[%s770_s16 + $0x3] sm:$0x1] }
  0x40   : > { %v350_v63 = vadd.f32 %v349_v43, %v345_v51  ;;  %v398_v14 = vadd.f32 %v397_v52, %v393_v4  ;;  %v441_v16 = vadd.f32 %v440_v6, %v436_v5  ;;  %v450_v17 = vmul.f32 %v449_v3, %v448_v2  ;;  %v488_v60 = vld [vmem:[%s770_s16 + $0x3] sm:$0x1] }
  0x41   : > { %v416_v20 = vstv %s895_s7  ;;  %v459_v22 = vstv %s898_s8  ;;  %v412_v24 = vmul.f32 %v411_v11, %v410_v10  ;;  %v455_v26 = vmul.f32 %v454_v13, %v453_v12 }
  0x42   : > { %v355_v8 = vadd.f32 %v354_v44, %v350_v63  ;;  %v403_v23 = vadd.f32 %v402_v59, %v398_v14  ;;  %v446_v25 = vadd.f32 %v445_v7, %v441_v16  ;;  %v421_v29 = vstv %s902_s9  ;;  %v473_v44 = vld [vmem:[%s770_s16] sm:$0x1] }
  0x43   : > { %v464_v31 = vstv %s908_s11  ;;  %v417_v33 = vmul.f32 %v416_v20, %v415_v19  ;;  %v460_v35 = vmul.f32 %v459_v22, %v458_v21  ;;  %v426_v37 = vstv %s913_s12 }
  0x44   : > { %v360_v18 = vadd.f32 %v359_v47, %v355_v8  ;;  %v408_v32 = vadd.f32 %v407_v15, %v403_v23  ;;  %v451_v34 = vadd.f32 %v450_v17, %v446_v25  ;;  %v469_v39 = vstv %s919_s13 }
  0x45   : > { %v422_v41 = vmul.f32 %v421_v29, %v420_v28  ;;  %v465_v43 = vmul.f32 %v464_v31, %v463_v30  ;;  %v474_v45 = vstv %s925_s14  ;;  %v427_v47 = vmul.f32 %v426_v37, %v425_v36 }
  0x46   : > { %v365_v27 = vadd.f32 %v364_v9, %v360_v18  ;;  %v413_v40 = vadd.f32 %v412_v24, %v408_v32  ;;  %v456_v42 = vadd.f32 %v455_v26, %v451_v34  ;;  %v470_v49 = vmul.f32 %v469_v39, %v468_v38 }
  0x47   : > { %v479_v51 = vstv %s931_s6  ;;  %v475_v54 = vmul.f32 %v474_v45, %v473_v44  ;;  %v484_v56 = vstv %s937_s17  ;;  %v489_v61 = vstv %s643_s18 }
  0x48   : > { %366 = vst [vmem:[%s864_s24 + $0x1] sm:$0x1] %v365_v27  ;;  %v418_v46 = vadd.f32 %v417_v33, %v413_v40  ;;  %v461_v48 = vadd.f32 %v460_v35, %v456_v42  ;;  %v480_v59 = vmul.f32 %v479_v51, %v478_v50  ;;  %v485_v63 = vmul.f32 %v484_v56, %v483_v55 }
  0x49   : > { %v490_v1 = vmul.f32 %v489_v61, %v488_v60 }
  0x4a   : > { %v423_v52 = vadd.f32 %v422_v41, %v418_v46  ;;  %v466_v53 = vadd.f32 %v465_v43, %v461_v48 }
  0x4c   : > { %v428_v57 = vadd.f32 %v427_v47, %v423_v52  ;;  %v471_v58 = vadd.f32 %v470_v49, %v466_v53 }
  0x4e   : > { %429 = vst [vmem:[%s864_s24 + $0x2] sm:$0x1] %v428_v57  ;;  %v476_v62 = vadd.f32 %v475_v54, %v471_v58 }
  0x50   : > { %v481_v0 = vadd.f32 %v480_v59, %v476_v62 }
  0x52   : > { %v486_v2 = vadd.f32 %v485_v63, %v481_v0 }
  0x54   : > { %v491_v3 = vadd.f32 %v490_v1, %v486_v2 }
  0x56   : > { %492 = vst [vmem:[%s864_s24 + $0x3] sm:$0x1] %v491_v3 }
  0x57 PF: > { %s15_s15 = sadd.s32 1, %s690_s15  }
  0x58   : > { %p12_p1 = scmp.ge.s32.totalorder %s15_s15, 4  }
  0x5a   :  { %14 = sbr.rel (!%p12_p1) target bundleno = 1 (0x1), region = 77 }
  0x61   :  { %512 = vsyncpa [#allocation3], 1 }
  0x62   :  { %514 = vsyncpa [#allocation3 + $0x1], 1 }

</bundles_post_ra>
